<compile_context>
chip_gen: v5e
topology: v5e:2x2
jax: 0.10.0
libtpu: 0.0.40
codegen_flags: <defaults>
</compile_context>

<pallas_src>
import math

import jax
import jax.numpy as jnp
from jax.experimental import pallas as pl
from jax.experimental.pallas import tpu as pltpu


def fused_mlp_kernel(x_ref, w_ref, b_ref, o_ref):
    # x_ref: (TR, 128) packed samples; w_ref: (128, 128) block-diagonal weight;
    # b_ref: (1, 128) tiled bias; o_ref: (TR, 128).
    y = jnp.dot(x_ref[...], w_ref[...], preferred_element_type=jnp.float32)
    o_ref[...] = (y + b_ref[...]).astype(o_ref.dtype)


def _round_up(a, m):
    return -(-a // m) * m


def mlp_forward(x, w1, b1, w2, b2, *, tile_rows=8192, use_pallas=None,
                min_pallas_rows=256):
    """x: (B, 8) f32; w1: (8, 16); b1: (1, 16); w2: (16, 8); b2: (1, 8).

    Computes (x @ w1 + b1) @ w2 + b2 (== PyTorch layer_2(layer_1(x)) with
    weights stored pre-transposed as (in, out)).
    """
    B, d_in = x.shape
    d_hid = w1.shape[1]
    d_out = w2.shape[1]
    assert w1.shape == (d_in, d_hid)
    assert b1.shape == (1, d_hid)
    assert w2.shape == (d_hid, d_out)
    assert b2.shape == (1, d_out)
    assert d_in == d_out == 8, "block-diagonal packing assumes 8-wide features"

    # --- 1. algebraic fusion of the two (activation-free) linear layers -----
    W = w1 @ w2                      # (8, 8)
    b = b1 @ w2 + b2                 # (1, 8)

    if B == 0:                       # degenerate batch guard
        return jnp.zeros((0, d_out), x.dtype)

    P = 128 // d_in                  # 16 samples per 128-lane row
    rows = B // P                    # full packed rows (tail handled in XLA)

    if use_pallas is None:
        use_pallas = rows >= min_pallas_rows
    if (not use_pallas) or rows == 0:
        # Small-batch fast path: kernel launch overhead would dominate.
        return (x @ W + b).astype(x.dtype)

    # --- 2. lane-dense packing without any pad copy --------------------------
    B_main = rows * P
    # Free view when B % 16 == 0; otherwise a cheap prefix slice (no zero-pad
    # of the whole tensor, no scatter).
    x_main = x[:B_main].reshape(rows, P * d_in)            # (rows, 128)

    W_bd = jnp.kron(jnp.eye(P, dtype=W.dtype), W)          # (128, 128)
    b_bd = jnp.tile(b, (1, P))                              # (1, 128)

    # --- 3. row tile: big enough to amortize per-step overhead, small enough
    #        to give >=4 grid steps (v7x megacore) and fit default VMEM -------
    tr = min(int(tile_rows), _round_up(pl.cdiv(rows, 4), 8))
    tr = max(tr, 8)
    grid = (pl.cdiv(rows, tr),)      # ragged last block handled by Pallas

    out_rows = pl.pallas_call(
        fused_mlp_kernel,
        out_shape=jax.ShapeDtypeStruct((rows, P * d_out), x.dtype),
        grid=grid,
        in_specs=[
            pl.BlockSpec((tr, P * d_in), lambda i: (i, 0)),
            pl.BlockSpec((P * d_in, P * d_out), lambda i: (0, 0)),  # resident
            pl.BlockSpec((1, P * d_out), lambda i: (0, 0)),         # resident
        ],
        out_specs=pl.BlockSpec((tr, P * d_out), lambda i: (i, 0)),
        compiler_params=pltpu.CompilerParams(
            dimension_semantics=("parallel",),
            vmem_limit_bytes=32 * 1024 * 1024,
        ),
        cost_estimate=pl.CostEstimate(
            flops=2 * rows * (P * d_in) * (P * d_out),
            transcendentals=0,
            bytes_accessed=(rows * P * (d_in + d_out) * 4
                            + (P * d_in) * (P * d_out) * 4
                            + P * d_out * 4),
        ),
    )(x_main, W_bd, b_bd)

    out_main = out_rows.reshape(B_main, d_out)

    tail_n = B - B_main              # 0..15 leftover samples
    if tail_n == 0:
        return out_main
    out_tail = (x[B_main:] @ W + b).astype(x.dtype)
    return jnp.concatenate([out_main, out_tail], axis=0)


def init_params(key):
    """Deterministic init mimicking nn.Linear's U(-1/sqrt(fan_in), 1/sqrt(fan_in))."""
    d_in, d_hid, d_out = 8, 16, 8
    k1, k2, k3, k4 = jax.random.split(key, 4)
    bound1 = 1.0 / math.sqrt(d_in)
    bound2 = 1.0 / math.sqrt(d_hid)
    # Stored already transposed: (in, out).
    w1 = jax.random.uniform(k1, (d_in, d_hid), jnp.float32, -bound1, bound1)
    b1 = jax.random.uniform(k2, (1, d_hid), jnp.float32, -bound1, bound1)
    w2 = jax.random.uniform(k3, (d_hid, d_out), jnp.float32, -bound2, bound2)
    b2 = jax.random.uniform(k4, (1, d_out), jnp.float32, -bound2, bound2)
    return w1, b1, w2, b2


if __name__ == "__main__":
    key = jax.random.PRNGKey(0)
    kx1, kx2, kx3, kp = jax.random.split(key, 4)
    w1, b1, w2, b2 = init_params(kp)

    def ref_fn(x):
        return (x @ w1 + b1) @ w2 + b2

    # 1) Small case matching the spec (batch=2, features=8) -> fast path.
    x_small = jax.random.normal(kx1, (2, 8), dtype=jnp.float32)
    out_small = jax.block_until_ready(
        mlp_forward(x_small, w1, b1, w2, b2, use_pallas=True))
    assert out_small.shape == (2, 8)
    assert jnp.allclose(out_small, ref_fn(x_small), atol=1e-5, rtol=1e-5)

    # 2) Ragged batch: exercises the Pallas kernel with a masked last row-block
    #    plus the <16-sample XLA tail epilogue (no whole-array padding).
    x_rag = jax.random.normal(kx2, (333, 8), dtype=jnp.float32)
    out_rag = jax.block_until_ready(
        mlp_forward(x_rag, w1, b1, w2, b2, use_pallas=True))
    assert out_rag.shape == (333, 8)
    assert jnp.allclose(out_rag, ref_fn(x_rag), atol=1e-5, rtol=1e-5)

    # 3) Multiple-of-16 batch: pure view-reshape path, multi-step parallel grid.
    x_big = jax.random.normal(kx3, (4096, 8), dtype=jnp.float32)
    out_big = jax.block_until_ready(
        mlp_forward(x_big, w1, b1, w2, b2, use_pallas=True))
    assert out_big.shape == (4096, 8)
    assert jnp.allclose(out_big, ref_fn(x_big), atol=1e-5, rtol=1e-5)

    print("KERNEL_OK")
</pallas_src>

<mosaic_0001>
module attributes {stable_mosaic.version = 11 : i64} {
  func.func @fused_mlp_kernel(%arg0: i32, %arg1: memref<8x128xf32, #tpu.memory_space<vmem>>, %arg2: memref<128x128xf32, #tpu.memory_space<vmem>>, %arg3: memref<1x128xf32, #tpu.memory_space<vmem>>, %arg4: memref<8x128xf32, #tpu.memory_space<vmem>>) attributes {dimension_semantics = [#tpu.dimension_semantics<parallel>], iteration_bounds = array<i64: 3>, scalar_prefetch = 0 : i64, scratch_operands = 0 : i64, tpu.core_type = #tpu.core_type<tc>, window_params = [{transform_indices = @transform_0, window_bounds = array<i64: 8, 128>}, {pipeline_mode = #tpu.pipeline_mode<synchronous>, transform_indices = @transform_1, window_bounds = array<i64: 128, 128>}, {pipeline_mode = #tpu.pipeline_mode<synchronous>, transform_indices = @transform_2, window_bounds = array<i64: 1, 128>}, {transform_indices = @transform_3, window_bounds = array<i64: 8, 128>}]} {
    %c0 = arith.constant 0 : index
    %c0_0 = arith.constant 0 : index
    %0 = vector.load %arg1[%c0, %c0_0] : memref<8x128xf32, #tpu.memory_space<vmem>>, vector<8x128xf32>
    %c0_1 = arith.constant 0 : index
    %c0_2 = arith.constant 0 : index
    %1 = vector.load %arg2[%c0_1, %c0_2] : memref<128x128xf32, #tpu.memory_space<vmem>>, vector<128x128xf32>
    %cst = arith.constant dense<0.000000e+00> : vector<8x128xf32>
    %2 = tpu.matmul %0, %1, %cst {dimension_numbers = #tpu.dot_dimension_numbers<[1], [0], [0], [1], [0, 0, 1, 1], [], []>} : vector<8x128xf32>, vector<128x128xf32>, vector<8x128xf32> -> vector<8x128xf32>
    %c0_3 = arith.constant 0 : index
    %c0_4 = arith.constant 0 : index
    %3 = vector.load %arg3[%c0_3, %c0_4] : memref<1x128xf32, #tpu.memory_space<vmem>>, vector<1x128xf32>
    %4 = vector.broadcast %3 : vector<1x128xf32> to vector<8x128xf32>
    %5 = arith.addf %2, %4 : vector<8x128xf32>
    %c0_5 = arith.constant 0 : index
    %c0_6 = arith.constant 0 : index
    %6 = vector.load %arg4[%c0_5, %c0_6] : memref<8x128xf32, #tpu.memory_space<vmem>>, vector<8x128xf32>
    tpu.vector_store %arg4[%c0_5, %c0_6], %5 {strides = array<i32>} : memref<8x128xf32, #tpu.memory_space<vmem>>, vector<8x128xf32>,
    return
  }
  func.func @transform_0(%arg0: i32) -> (i32, i32) {
    %c0_i32 = arith.constant 0 : i32
    %c0_i32_0 = arith.constant 0 : i32
    return %arg0, %c0_i32 : i32, i32
  }
  func.func @transform_1(%arg0: i32) -> (i32, i32) {
    %c0_i32 = arith.constant 0 : i32
    %c0_i32_0 = arith.constant 0 : i32
    %c0_i32_1 = arith.constant 0 : i32
    return %c0_i32, %c0_i32_0 : i32, i32
  }
  func.func @transform_2(%arg0: i32) -> (i32, i32) {
    %c0_i32 = arith.constant 0 : i32
    %c0_i32_0 = arith.constant 0 : i32
    %c0_i32_1 = arith.constant 0 : i32
    return %c0_i32, %c0_i32_0 : i32, i32
  }
  func.func @transform_3(%arg0: i32) -> (i32, i32) {
    %c0_i32 = arith.constant 0 : i32
    %c0_i32_0 = arith.constant 0 : i32
    return %arg0, %c0_i32 : i32, i32
  }
}

</mosaic_0001>

<bundles_post_ra>
// kernel: tpu_custom_call.1
= control target key start
LH: loop header
LB: loop body
LE: loop exit
PB: predicated region body
PF: predicated region fallthrough
CT: control target
= control target key end

     0   :  { %8 = vsyncpa [#allocation3], 0  ;;  %s716_s0 = inlined_call_operand.hbm [shape: f32[20,128], index: 0, kind: input, shape index: {}]   ;;  %s717_s1 = inlined_call_operand.hbm [shape: f32[128,128], index: 1, kind: input, shape index: {}]   ;;  %s718_s2 = inlined_call_operand.vmem [shape: f32[1,128], index: 2, kind: input, shape index: {}]   ;;  %s719_s3 = inlined_call_operand.hbm [shape: f32[20,128], index: 3, kind: output, shape index: {}]  }
   0x1   :  { %10 = vsyncpa [#allocation3 + $0x1], 0 }
   0x2   :  { %11 = vsyncpa [#allocation6], 0 }
   0x3   :  { %12 = vsyncpa [#allocation4], 0 }
   0x4   :  { %14 = vsyncpa [#allocation4 + $0x1], 0  ;;  %s572_s12 = smov 0   ;;  %s574_s13 = smov 0  }
   0x5   :  { %s576_s14 = smov 0   ;;  %s578_s15 = smov 0  }
   0x6 LB: > { %s130_s18 = sshll.u32 %s717_s1, 4  ;;  %s596_s19 = sadd.s32 4294967295, %s547_s15   ;;  %s547_s15 = sphi %s578_s15, %s728_s15   ;;  %s543_s14 = sphi %s576_s14, %s727_s14   ;;  %s539_s13 = sphi %s574_s13, %s726_s13   ;;  %s535_s12 = sphi %s572_s12, %s725_s12   ;;  %s131_s18 = int_to_ptr.hbm [resolvable:$true] %s130_s18 }
   0x7   : > { %p344_p0 = scmp.ge.s32.totalorder %s547_s15, 1  ;;  %p41_p1 = scmp.eq.s32.totalorder %s596_s19, 0 }
   0x8   : > { %p119_p2 = scmp.lt.s32.totalorder %s547_s15, 4  ;;  %s549_s21 = smov [#allocation5]  }
   0x9   : > { %s132_s22 = sshll.u32 %s549_s21, 4  ;;  %s550_s23 = smov 128   ;;  %s133_s22 = int_to_ptr.vmem [resolvable:$true] %s132_s22 }
   0xa   : > { %p601_p3 = pnand %p344_p0, %p119_p2  ;;  %s551_s24 = smov 8  }
   0xb   : > { %s343_s25 = sadd.s32 4294967294, %s547_s15   ;;  %s611_s26 = sadd.s32 1, %s547_s15  }
   0xc   : > { %p365_p4 = pneg %p601_p3  ;;  %s27_s27 = sadd.s32 1, %s543_s14 }
   0xd   : > { %s24_s28 = ssub.s32 %s547_s15, %s611_s26  ;;  %p34_p6 = scmp.ne.s32.totalorder %s543_s14, %s539_s13 }
   0xe   : > { %p366_p5 = pnand %p365_p4, %p41_p1  ;;  %p25_p7 = scmp.eq.s32.totalorder %s24_s28, 0 }
   0xf   : > { %p35_p8 = scmp.eq.s32.totalorder %s547_s15, 0  ;;  %p40_p9 = scmp.ne.s32.totalorder %s539_s13, %s535_s12 }
  0x10   : > { %368 = dma.hbm_to_vmem [thread:$0]  (!%p366_p5), %s131_s18, 2048, %s133_s22, [#allocation6], %s550_s23, %s550_s23, %s551_s24  }
  0x11   : > { %p106_p10 = scmp.eq.s32.totalorder %s596_s19, 2  ;;  %p627_p11 = por %p41_p1, %p40_p9 }
  0x12   : > { %s623_s29 = scalar_select %p25_p7, %s543_s14, %s27_s27  }
  0x13   : > { %p631_p12 = por %p106_p10, %p34_p6  ;;  %p112_p13 = scmp.eq.s32.totalorder %s343_s25, 2 }
  0x14   : > { %p36_p0 = por %p35_p8, %p34_p6  ;;  %s149_s5 = sand.u32 1, %s543_s14  }
  0x15   : > { %p636_p2 = por %p112_p13, %p40_p9  ;;  %p378_p4 = scmp.lt.s32.totalorder %s547_s15, 3 }
  0x16   : > { %s347_s7 = sshll.u32 %s149_s5, 3  ;;  %s348_s8 = sshll.u32 %s547_s15, 3 }
  0x17   : > { %s157_s11 = scalar_lea.hbm %s716_s0, %s348_s8  ;;  %s153_s17 = scalar_lea.vmem [#allocation2], %s347_s7 }
  0x18   : > { %s159_s16 = sshll.u32 %s157_s11, 4  ;;  %s161_s18 = sshll.u32 %s153_s17, 4  ;;  %s160_s16 = int_to_ptr.hbm [resolvable:$true] %s159_s16  ;;  %s162_s18 = int_to_ptr.vmem [resolvable:$true] %s161_s18 }
  0x19   : > { %p645_p5 = pnand %p378_p4, %p36_p0  ;;  %s150_s22 = scalar_lea.sflag [#allocation3], %s149_s5 }
  0x1a   : > { %s447_s23 = sshra.s32 %s160_s16, 4  ;;  %s454_s28 = scalar_lea.hbm %s716_s0, 24  ;;  %s448_s23 = int_to_ptr.hbm [resolvable:$true] %s447_s23 }
  0x1b   : > { %s449_s24 = scalar_lea.hbm %s448_s23, 8  ;;  %p451_p7 = pneg %p645_p5 }
  0x1c   : > { %p450_p6 = scmp.ne.s32.totalorder %s448_s23, %s449_s24  ;;  %p455_p10 = scmp.lt.s32.totalorder %s448_s23, %s716_s0 }
  0x1d   : > { %p456_p13 = scmp.lt.s32.totalorder %s454_s28, %s449_s24 }
  0x1e   : > { %p452_p8 = pnand %p451_p7, %p450_p6 }
  0x1f   : > { %p457_p0 = por %p456_p13, %p455_p10 }
  0x20   : > { %p453_p9 = pneg %p452_p8 }
  0x22   : > { %p458_p4 = pnand %p457_p0, %p453_p9 }
  0x24   : > { %461 = shalt.err (!%p458_p4)
}
  0x25   : > { %372 = dma.hbm_to_vmem [thread:$0]  (!%p645_p5), %s160_s16, 128, %s162_s18, %s150_s22  }
  0x26   : > { %170 = sbr.rel (%p601_p3) target bundleno = 209 (0xd1), region = 32  ;;  %s662_s5 = sand.u32 (!%p601_p3), 1, %s539_s13  }
  0x27   : > { %s350_s9 = sshll.u32 (!%p601_p3), %s662_s5, 3  ;;  %s173_s10 = scalar_lea.sflag (!%p601_p3), [#allocation3], %s662_s5 }
  0x28   : > { %s668_s11 = scalar_lea.vmem (!%p601_p3), [#allocation2], %s350_s9 }
  0x2b   : > { %522 = dma.done.wait (%p627_p11), %s173_s10, 128  }
  0x2c   : > { %524 = vsyncadd (%p627_p11), %s173_s10, 4294967168 }
  0x2d   : > { %526 = dma.done.wait (%p41_p1), [#allocation6], 2048  }
  0x2e   : > { %528 = vsyncadd (%p41_p1), [#allocation6], 4294965248  ;;  %v221_v0 = vld [vmem:[#allocation5 + $0x78] sm:$0xff]  ;;  %v220_v1 = vld [vmem:[#allocation5 + $0x70] sm:$0xff]  ;;  %s354_s20 = sshll.u32 %s596_s19, 3  ;;  %s204_s22 = scalar_lea.vmem [#allocation7], %s350_s9 }
  0x2f   : > { %226 = vmatpush.msra.mxu0 %v221_v0  ;;  %v219_v2 = vld [vmem:[#allocation5 + $0x68] sm:$0xff]  ;;  %v218_v3 = vld [vmem:[#allocation5 + $0x60] sm:$0xff]  ;;  %v217_v4 = vld [vmem:[#allocation5 + $0x58] sm:$0xff]  ;;  %s258_s17 = scalar_lea.hbm %s719_s3, %s354_s20  ;;  %s260_s23 = sshll.u32 %s204_s22, 4  ;;  %s261_s23 = int_to_ptr.vmem [resolvable:$true] %s260_s23 }
  0x30   : > { %v216_v5 = vld [vmem:[#allocation5 + $0x50] sm:$0xff]  ;;  %v215_v6 = vld [vmem:[#allocation5 + $0x48] sm:$0xff]  ;;  %v214_v7 = vld [vmem:[#allocation5 + $0x40] sm:$0xff]  ;;  %s262_s24 = sshll.u32 %s258_s17, 4  ;;  %s248_s25 = scalar_lea.sflag [#allocation4], %s662_s5  ;;  %s263_s24 = int_to_ptr.hbm [resolvable:$true] %s262_s24 }
  0x31   : > { %227 = vmatpush.msra.mxu0 %v220_v1  ;;  %v213_v8 = vld [vmem:[#allocation5 + $0x38] sm:$0xff]  ;;  %v212_v9 = vld [vmem:[#allocation5 + $0x30] sm:$0xff]  ;;  %v211_v10 = vld [vmem:[#allocation5 + $0x28] sm:$0xff]  ;;  %s491_s19 = sshra.s32 %s263_s24, 4  ;;  %s497_s8 = scalar_lea.hbm %s719_s3, 24  ;;  %s492_s19 = int_to_ptr.hbm [resolvable:$true] %s491_s19 }
  0x32   : > { %v210_v11 = vld [vmem:[#allocation5 + $0x20] sm:$0xff]  ;;  %v209_v12 = vld [vmem:[#allocation5 + $0x18] sm:$0xff]  ;;  %v208_v13 = vld [vmem:[#allocation5 + $0x10] sm:$0xff]  ;;  %s493_s27 = scalar_lea.hbm %s492_s19, 8  ;;  %p498_p5 = scmp.lt.s32.totalorder %s492_s19, %s719_s3 }
  0x33   : > { %228 = vmatpush.msra.mxu0 %v219_v2  ;;  %v207_v14 = vld [vmem:[#allocation5 + $0x8] sm:$0xff]  ;;  %v206_v15 = vld [vmem:[#allocation5] sm:$0xff]  ;;  %v205_v16 = vld [vmem:[%s668_s11] sm:$0xff]  ;;  %p494_p1 = scmp.ne.s32.totalorder %s492_s19, %s493_s27  ;;  %p499_p6 = scmp.lt.s32.totalorder %s497_s8, %s493_s27 }
  0x34   : > { %v416_v17 = vld [vmem:[%s718_s2] ss:$0 sm:$0xff] }
  0x35   : > { %229 = vmatpush.msra.mxu0 %v218_v3  ;;  %p495_p3 = pnand %p494_p1, %p631_p12  ;;  %p500_p7 = por %p499_p6, %p498_p5 }
  0x37   : > { %230 = vmatpush.msra.mxu0 %v217_v4  ;;  %p496_p11 = pneg %p495_p3 }
  0x39   : > { %231 = vmatpush.msra.mxu0 %v216_v5  ;;  %p501_p8 = pnand %p500_p7, %p496_p11 }
  0x3b   : > { %232 = vmatpush.msra.mxu0 %v215_v6 }
  0x3d   : > { %233 = vmatpush.msra.mxu0 %v214_v7 }
  0x3f   : > { %234 = vmatpush.msra.mxu0 %v213_v8 }
  0x41   : > { %235 = vmatpush.msra.mxu0 %v212_v9 }
  0x43   : > { %236 = vmatpush.msra.mxu0 %v211_v10 }
  0x45   : > { %237 = vmatpush.msra.mxu0 %v210_v11 }
  0x47   : > { %238 = vmatpush.msra.mxu0 %v209_v12 }
  0x49   : > { %239 = vmatpush.msra.mxu0 %v208_v13 }
  0x4b   : > { %240 = vmatpush.msra.mxu0 %v207_v14 }
  0x4d   : > { %241 = vmatpush.msra.mxu0 %v206_v15 }
  0x4e   : > { %242 = vmatmul.f32.vlgmr.msra.gmra.mxu0 %v205_v16 }
  0xcb   : > { %v243_v18 = vpop.f32.mrf.mxu0 }
  0xcc   : > { %v244_v19 = vadd.f32 %v416_v17, %v243_v18 }
  0xce   : > { %246 = vst [vmem:[%s204_s22] sm:$0xff] %v244_v19 }
  0xcf   : > { %504 = shalt.err (!%p501_p8)
}
  0xd0   : > { %363 = dma.vmem_to_hbm [thread:$0]  (%p631_p12), %s261_s23, 128, %s263_s24, %s248_s25  }
  0xd1 PF: > { %p380_p9 = scmp.ge.s32.totalorder %s547_s15, 2  ;;  %s274_s5 = sand.u32 1, %s535_s12  }
  0xd2   : > { %s275_s11 = scalar_lea.sflag [#allocation4], %s274_s5 }
  0xd3   : > { %p374_p10 = pnand %p380_p9, %p636_p2 }
  0xd5   : > { %p375_p13 = pneg %p374_p10 }
  0xd7   : > { %530 = dma.done.wait (%p375_p13), %s275_s11, 128  }
  0xd8   : > { %532 = vsyncadd (%p375_p13), %s275_s11, 4294967168  ;;  %p17_p0 = scmp.ge.s32.totalorder %s611_s26, 5   ;;  %s725_s12 = smov %s539_s13 }
  0xd9   : > { %s726_s13 = smov %s543_s14  ;;  %s727_s14 = smov %s623_s29 }
  0xda   : > { %s728_s15 = smov %s611_s26  ;;  %19 = sbr.rel (!%p17_p0) target bundleno = 6 (0x6), region = 81 }
  0xdf   :  { %281 = vsyncpa [#allocation3], 1 }
  0xe0   :  { %283 = vsyncpa [#allocation3 + $0x1], 1 }
  0xe1   :  { %284 = vsyncpa [#allocation6], 1 }
  0xe2   :  { %285 = vsyncpa [#allocation4], 1 }
  0xe3   :  { %287 = vsyncpa [#allocation4 + $0x1], 1 }

</bundles_post_ra>
